<compile_context>
chip_gen: v7x
topology: tpu7x:2x2x1
jax: 0.10.0
libtpu: 0.0.40
codegen_flags: <defaults>
</compile_context>

<pallas_src>
import jax
import jax.numpy as jnp
import numpy as np
from jax.experimental import pallas as pl
from jax.experimental.pallas import tpu as pltpu

# --- HyenaOperator hyper-parameters (defaults, small toy sizes) -------------
B = 2            # batch
L = 16           # sequence length == max_length
DIM = 16         # model dim
ORDER = 2
NUM_HEADS = 1
INNER_FACTOR = 2
PROJ_GROUPS = 4
SHORT_K = 3      # short_filter_order

INNER = INNER_FACTOR * DIM                   # 32  (= head_dim, num_heads=1)
TOTAL_W = INNER * (ORDER + 1)                # 96
PROJ_OUT = TOTAL_W // PROJ_GROUPS            # 24
BL = B * L
assert TOTAL_W % PROJ_GROUPS == 0

# rows of the packed small-parameter array
_ROW_BIN = 0          # in_proj bias (tiled over proj_groups)
_ROW_SW0 = 1          # short-filter tap for x[t-2]
_ROW_SW1 = 2          # short-filter tap for x[t-1]
_ROW_SW2 = 3          # short-filter tap for x[t]
_ROW_SB = 4           # short-filter bias
_ROW_BL = 5           # long-conv ("fftconv") bias, first INNER lanes
_ROW_BOUT = 6         # out_proj bias, first DIM lanes
_PACKED_ROWS = 8      # 7 used + 1 zero pad row (sublane-aligned)


def hyena_kernel(u_ref, w_in_ref, w_out_ref, k_ref, pk_ref, o_ref):
    pk = pk_ref[...]                                    # (8, TOTAL_W) f32, one load
    b_in = pk[_ROW_BIN:_ROW_BIN + 1, :]                 # (1, TOTAL_W)
    sw0 = pk[_ROW_SW0:_ROW_SW0 + 1, :]                  # tap * x[t-2]
    sw1 = pk[_ROW_SW1:_ROW_SW1 + 1, :]                  # tap * x[t-1]
    sw2 = pk[_ROW_SW2:_ROW_SW2 + 1, :]                  # tap * x[t]
    sb = pk[_ROW_SB:_ROW_SB + 1, :]
    bias_l = pk[_ROW_BL:_ROW_BL + 1, :INNER]
    b_out = pk[_ROW_BOUT:_ROW_BOUT + 1, :DIM]

    # --- in_proj (proj_groups channel-tiling folded into the weight) --------
    # bf16 MXU matmul, f32 accumulation; all element-wise math below stays f32.
    u = u_ref[...].astype(jnp.bfloat16)                 # (L, DIM)
    up = jnp.dot(u, w_in_ref[...],
                 preferred_element_type=jnp.float32) + b_in       # (L, TOTAL_W)

    # --- causal depthwise short filter (Conv1d k=3, groups=C, pad=2, [:L]) --
    # x[t-1], x[t-2] are masked sublane rolls: XLU rotate + VPU select — the
    # former shift-matrix matmul (underfilled K, MXU round-trip) is removed.
    row_w = jax.lax.broadcasted_iota(jnp.int32, (L, TOTAL_W), 0)
    up1 = jnp.where(row_w >= 1, pltpu.roll(up, shift=1, axis=0), 0.0)
    up2 = jnp.where(row_w >= 2, pltpu.roll(up, shift=2, axis=0), 0.0)
    uc = sw2 * up + sw1 * up1 + sw0 * up2 + sb          # f32 VPU FMAs

    # split channels; gate (dropout p=0 == identity)
    x0 = uc[:, 0:INNER]
    x1 = uc[:, INNER:2 * INNER]
    v = uc[:, 2 * INNER:3 * INNER] * x1                 # (L, INNER)

    # --- long causal depthwise conv: vc[t,d] = sum_j k[j,d] * v[t-j,d] ------
    # Per-lag masked roll + FMA (lag 0 needs neither).  Statically unrolled —
    # L is a small compile-time constant at this toy size; see time-tiling TODO.
    row_i = jax.lax.broadcasted_iota(jnp.int32, (L, INNER), 0)
    kf = k_ref[...]                                     # (L, INNER) f32
    acc = v * kf[0:1, :]
    for j in range(1, L):
        vj = jnp.where(row_i >= j, pltpu.roll(v, shift=j, axis=0), 0.0)
        acc = acc + vj * kf[j:j + 1, :]
    vc = acc + v * bias_l                               # "+ x * D" term of fftconv

    # --- output gate + out_proj ----------------------------------------------
    y = vc * x0
    out = jnp.dot(y.astype(jnp.bfloat16), w_out_ref[...],
                  preferred_element_type=jnp.float32) + b_out
    o_ref[...] = out                                    # (L, DIM) slab store


def hyena_forward(u, params):
    w_in_b, w_out_b, k2d, packed = params
    u2 = u.reshape(BL, DIM)                             # rows = (batch, time)
    out2 = pl.pallas_call(
        hyena_kernel,
        out_shape=jax.ShapeDtypeStruct((BL, DIM), jnp.float32),
        grid=(B,),
        in_specs=[
            pl.BlockSpec((L, DIM), lambda b: (b, 0)),               # u, per-batch tile
            pl.BlockSpec((DIM, TOTAL_W), lambda b: (0, 0)),         # in_proj W (bf16, tiled)
            pl.BlockSpec((INNER, DIM), lambda b: (0, 0)),           # out_proj W (bf16)
            pl.BlockSpec((L, INNER), lambda b: (0, 0)),             # k, lag-major (L, INNER)
            pl.BlockSpec((_PACKED_ROWS, TOTAL_W), lambda b: (0, 0)),  # packed small params
        ],
        out_specs=pl.BlockSpec((L, DIM), lambda b: (b, 0)),
        compiler_params=pltpu.CompilerParams(dimension_semantics=("parallel",)),
    )(u2, w_in_b, w_out_b, k2d, packed)
    return out2.reshape(B, L, DIM)


def init_params(key):
    # Deterministic synthetic init (shapes follow HyenaOperator.__init__).
    keys = jax.random.split(key, 8)
    w_in = jax.random.normal(keys[0], (DIM, PROJ_OUT), jnp.float32) / np.sqrt(DIM)
    b_in = jax.random.normal(keys[1], (PROJ_OUT,), jnp.float32) * 0.1
    sw = jax.random.normal(keys[2], (TOTAL_W, SHORT_K), jnp.float32) / np.sqrt(SHORT_K)
    sb = jax.random.normal(keys[3], (TOTAL_W,), jnp.float32) * 0.1
    # TODO(synk): RTF / HyenaFilter parameterization of the long filter is not
    # reimplemented; k is a deterministic random filter of the same shape.
    k_long = jax.random.normal(keys[4], (INNER, L), jnp.float32) / L
    bias_l = jax.random.normal(keys[5], (INNER,), jnp.float32)
    w_out = jax.random.normal(keys[6], (INNER, DIM), jnp.float32) / np.sqrt(INNER)
    b_out = jax.random.normal(keys[7], (DIM,), jnp.float32) * 0.1
    return w_in, b_in, sw, sb, k_long, bias_l, w_out, b_out


def pack_params(raw):
    w_in, b_in, sw, sb, k_long, bias_l, w_out, b_out = raw

    # Fold the `u.repeat(1,1,proj_groups)` channel-tiling into the projection
    # weight and pre-cast both projection weights to bf16 (MXU native).
    w_in_b = jnp.tile(w_in, (1, PROJ_GROUPS)).astype(jnp.bfloat16)   # (DIM, TOTAL_W)
    w_out_b = w_out.astype(jnp.bfloat16)                             # (INNER, DIM)

    # Long filter passed lag-major, un-broadcast: row j carries k[:, j].
    k2d = jnp.asarray(k_long.T)                                      # (L, INNER)

    # Consolidate the small parameter vectors into one VMEM-friendly array.
    packed = jnp.zeros((_PACKED_ROWS, TOTAL_W), jnp.float32)
    packed = packed.at[_ROW_BIN, :].set(jnp.tile(b_in, (PROJ_GROUPS,)))
    packed = packed.at[_ROW_SW0:_ROW_SW2 + 1, :].set(sw.T)           # taps 0..2
    packed = packed.at[_ROW_SB, :].set(sb)
    packed = packed.at[_ROW_BL, :INNER].set(bias_l)
    packed = packed.at[_ROW_BOUT, :DIM].set(b_out)

    return w_in_b, w_out_b, k2d, packed


def reference(u, raw):
    # Pure-JAX reference mirroring the PyTorch forward pass.  The two
    # projection matmuls round their inputs to bf16 to match the kernel's MXU
    # precision policy (f32 accumulation); every other op is f32.
    w_in, b_in, sw, sb, k_long, bias_l, w_out, b_out = raw
    hp = jax.lax.Precision.HIGHEST
    bf = jnp.bfloat16
    proj = jnp.einsum('bld,dp->blp', u.astype(bf), w_in.astype(bf),
                      preferred_element_type=jnp.float32) + b_in
    proj = jnp.tile(proj, (1, 1, PROJ_GROUPS))                # (B, L, TOTAL_W)
    x = jnp.transpose(proj, (0, 2, 1))                        # (B, TOTAL_W, L)
    xp = jnp.pad(x, ((0, 0), (0, 0), (2, 0)))
    uc = (sw[:, 0][None, :, None] * xp[:, :, 0:L]
          + sw[:, 1][None, :, None] * xp[:, :, 1:L + 1]
          + sw[:, 2][None, :, None] * xp[:, :, 2:L + 2]
          + sb[None, :, None])
    x0, x1, v = uc[:, 0:INNER], uc[:, INNER:2 * INNER], uc[:, 2 * INNER:]
    v = v * x1
    conv1 = lambda vd, kd: jnp.convolve(vd, kd, precision=hp)[:L]
    vc = jax.vmap(jax.vmap(conv1, in_axes=(0, 0)), in_axes=(0, None))(v, k_long)
    vc = vc + v * bias_l[None, :, None]
    y = vc * x0
    y = jnp.transpose(y, (0, 2, 1))
    return jnp.einsum('bld,dk->blk', y.astype(bf), w_out.astype(bf),
                      preferred_element_type=jnp.float32) + b_out


if __name__ == "__main__":
    key = jax.random.PRNGKey(0)
    ku, kp = jax.random.split(key)
    u = jax.random.normal(ku, (B, L, DIM), jnp.float32)
    raw = init_params(kp)
    params = pack_params(raw)

    out = hyena_forward(u, params)
    out = jax.block_until_ready(out)

    ref = reference(u, raw)
    np.testing.assert_allclose(np.asarray(out), np.asarray(ref, dtype=np.float32),
                               rtol=5e-3, atol=5e-3)
    print("KERNEL_OK")
</pallas_src>

<mosaic_0001>
module attributes {stable_mosaic.version = 11 : i64} {
  func.func @hyena_kernel(%arg0: i32, %arg1: memref<16x16xf32, #tpu.memory_space<vmem>>, %arg2: memref<16x96xbf16, #tpu.memory_space<vmem>>, %arg3: memref<32x16xbf16, #tpu.memory_space<vmem>>, %arg4: memref<16x32xf32, #tpu.memory_space<vmem>>, %arg5: memref<8x96xf32, #tpu.memory_space<vmem>>, %arg6: memref<16x16xf32, #tpu.memory_space<vmem>>) attributes {dimension_semantics = [#tpu.dimension_semantics<parallel>], iteration_bounds = array<i64: 2>, scalar_prefetch = 0 : i64, scratch_operands = 0 : i64, tpu.core_type = #tpu.core_type<tc>, window_params = [{transform_indices = @transform_0, window_bounds = array<i64: 16, 16>}, {pipeline_mode = #tpu.pipeline_mode<synchronous>, transform_indices = @transform_1, window_bounds = array<i64: 16, 96>}, {pipeline_mode = #tpu.pipeline_mode<synchronous>, transform_indices = @transform_2, window_bounds = array<i64: 32, 16>}, {pipeline_mode = #tpu.pipeline_mode<synchronous>, transform_indices = @transform_3, window_bounds = array<i64: 16, 32>}, {pipeline_mode = #tpu.pipeline_mode<synchronous>, transform_indices = @transform_4, window_bounds = array<i64: 8, 96>}, {transform_indices = @transform_5, window_bounds = array<i64: 16, 16>}]} {
    %c0 = arith.constant 0 : index
    %c0_0 = arith.constant 0 : index
    %0 = vector.load %arg5[%c0, %c0_0] : memref<8x96xf32, #tpu.memory_space<vmem>>, vector<8x96xf32>
    %1 = vector.extract_strided_slice %0 {offsets = [0, 0], sizes = [1, 96], strides = [1, 1]} : vector<8x96xf32> to vector<1x96xf32>
    %2 = vector.extract_strided_slice %0 {offsets = [1, 0], sizes = [1, 96], strides = [1, 1]} : vector<8x96xf32> to vector<1x96xf32>
    %3 = vector.extract_strided_slice %0 {offsets = [2, 0], sizes = [1, 96], strides = [1, 1]} : vector<8x96xf32> to vector<1x96xf32>
    %4 = vector.extract_strided_slice %0 {offsets = [3, 0], sizes = [1, 96], strides = [1, 1]} : vector<8x96xf32> to vector<1x96xf32>
    %5 = vector.extract_strided_slice %0 {offsets = [4, 0], sizes = [1, 96], strides = [1, 1]} : vector<8x96xf32> to vector<1x96xf32>
    %6 = vector.extract_strided_slice %0 {offsets = [5, 0], sizes = [1, 32], strides = [1, 1]} : vector<8x96xf32> to vector<1x32xf32>
    %7 = vector.extract_strided_slice %0 {offsets = [6, 0], sizes = [1, 16], strides = [1, 1]} : vector<8x96xf32> to vector<1x16xf32>
    %c0_1 = arith.constant 0 : index
    %c0_2 = arith.constant 0 : index
    %8 = vector.load %arg1[%c0_1, %c0_2] : memref<16x16xf32, #tpu.memory_space<vmem>>, vector<16x16xf32>
    %9 = arith.truncf %8 : vector<16x16xf32> to vector<16x16xbf16>
    %c0_3 = arith.constant 0 : index
    %c0_4 = arith.constant 0 : index
    %10 = vector.load %arg2[%c0_3, %c0_4] : memref<16x96xbf16, #tpu.memory_space<vmem>>, vector<16x96xbf16>
    %cst = arith.constant dense<0.000000e+00> : vector<16x96xf32>
    %11 = tpu.matmul %9, %10, %cst {dimension_numbers = #tpu.dot_dimension_numbers<[1], [0], [0], [1], [0, 0, 1, 1], [], []>} : vector<16x16xbf16>, vector<16x96xbf16>, vector<16x96xf32> -> vector<16x96xf32>
    %12 = vector.broadcast %1 : vector<1x96xf32> to vector<16x96xf32>
    %13 = arith.addf %11, %12 : vector<16x96xf32>
    %14 = tpu.iota {dimensions = array<i32: 0>} : vector<16x96xi32>
    %c1_i32 = arith.constant 1 : i32
    %15 = vector.broadcast %c1_i32 : i32 to vector<16x96xi32>
    %16 = arith.cmpi sge, %14, %15 : vector<16x96xi32>
    %c1_i32_5 = arith.constant 1 : i32
    %17 = tpu.dynamic_rotate %13 by %c1_i32_5 dim 0 : vector<16x96xf32>, i32 -> vector<16x96xf32>
    %cst_6 = arith.constant 0.000000e+00 : f32
    %18 = vector.broadcast %cst_6 : f32 to vector<16x96xf32>
    %19 = arith.select %16, %17, %18 : vector<16x96xi1>, vector<16x96xf32>
    %c2_i32 = arith.constant 2 : i32
    %20 = vector.broadcast %c2_i32 : i32 to vector<16x96xi32>
    %21 = arith.cmpi sge, %14, %20 : vector<16x96xi32>
    %c2_i32_7 = arith.constant 2 : i32
    %22 = tpu.dynamic_rotate %13 by %c2_i32_7 dim 0 : vector<16x96xf32>, i32 -> vector<16x96xf32>
    %cst_8 = arith.constant 0.000000e+00 : f32
    %23 = vector.broadcast %cst_8 : f32 to vector<16x96xf32>
    %24 = arith.select %21, %22, %23 : vector<16x96xi1>, vector<16x96xf32>
    %25 = vector.broadcast %4 : vector<1x96xf32> to vector<16x96xf32>
    %26 = arith.mulf %25, %13 : vector<16x96xf32>
    %27 = vector.broadcast %3 : vector<1x96xf32> to vector<16x96xf32>
    %28 = arith.mulf %27, %19 : vector<16x96xf32>
    %29 = arith.addf %26, %28 : vector<16x96xf32>
    %30 = vector.broadcast %2 : vector<1x96xf32> to vector<16x96xf32>
    %31 = arith.mulf %30, %24 : vector<16x96xf32>
    %32 = arith.addf %29, %31 : vector<16x96xf32>
    %33 = vector.broadcast %5 : vector<1x96xf32> to vector<16x96xf32>
    %34 = arith.addf %32, %33 : vector<16x96xf32>
    %35 = vector.extract_strided_slice %34 {offsets = [0, 0], sizes = [16, 32], strides = [1, 1]} : vector<16x96xf32> to vector<16x32xf32>
    %36 = vector.extract_strided_slice %34 {offsets = [0, 32], sizes = [16, 32], strides = [1, 1]} : vector<16x96xf32> to vector<16x32xf32>
    %37 = vector.extract_strided_slice %34 {offsets = [0, 64], sizes = [16, 32], strides = [1, 1]} : vector<16x96xf32> to vector<16x32xf32>
    %38 = arith.mulf %37, %36 : vector<16x32xf32>
    %39 = tpu.iota {dimensions = array<i32: 0>} : vector<16x32xi32>
    %c0_9 = arith.constant 0 : index
    %c0_10 = arith.constant 0 : index
    %40 = vector.load %arg4[%c0_9, %c0_10] : memref<16x32xf32, #tpu.memory_space<vmem>>, vector<16x32xf32>
    %41 = vector.extract_strided_slice %40 {offsets = [0, 0], sizes = [1, 32], strides = [1, 1]} : vector<16x32xf32> to vector<1x32xf32>
    %42 = vector.broadcast %41 : vector<1x32xf32> to vector<16x32xf32>
    %43 = arith.mulf %38, %42 : vector<16x32xf32>
    %c1_i32_11 = arith.constant 1 : i32
    %44 = vector.broadcast %c1_i32_11 : i32 to vector<16x32xi32>
    %45 = arith.cmpi sge, %39, %44 : vector<16x32xi32>
    %c1_i32_12 = arith.constant 1 : i32
    %46 = tpu.dynamic_rotate %38 by %c1_i32_12 dim 0 : vector<16x32xf32>, i32 -> vector<16x32xf32>
    %cst_13 = arith.constant 0.000000e+00 : f32
    %47 = vector.broadcast %cst_13 : f32 to vector<16x32xf32>
    %48 = arith.select %45, %46, %47 : vector<16x32xi1>, vector<16x32xf32>
    %49 = vector.extract_strided_slice %40 {offsets = [1, 0], sizes = [1, 32], strides = [1, 1]} : vector<16x32xf32> to vector<1x32xf32>
    %50 = vector.broadcast %49 : vector<1x32xf32> to vector<16x32xf32>
    %51 = arith.mulf %48, %50 : vector<16x32xf32>
    %52 = arith.addf %43, %51 : vector<16x32xf32>
    %c2_i32_14 = arith.constant 2 : i32
    %53 = vector.broadcast %c2_i32_14 : i32 to vector<16x32xi32>
    %54 = arith.cmpi sge, %39, %53 : vector<16x32xi32>
    %c2_i32_15 = arith.constant 2 : i32
    %55 = tpu.dynamic_rotate %38 by %c2_i32_15 dim 0 : vector<16x32xf32>, i32 -> vector<16x32xf32>
    %cst_16 = arith.constant 0.000000e+00 : f32
    %56 = vector.broadcast %cst_16 : f32 to vector<16x32xf32>
    %57 = arith.select %54, %55, %56 : vector<16x32xi1>, vector<16x32xf32>
    %58 = vector.extract_strided_slice %40 {offsets = [2, 0], sizes = [1, 32], strides = [1, 1]} : vector<16x32xf32> to vector<1x32xf32>
    %59 = vector.broadcast %58 : vector<1x32xf32> to vector<16x32xf32>
    %60 = arith.mulf %57, %59 : vector<16x32xf32>
    %61 = arith.addf %52, %60 : vector<16x32xf32>
    %c3_i32 = arith.constant 3 : i32
    %62 = vector.broadcast %c3_i32 : i32 to vector<16x32xi32>
    %63 = arith.cmpi sge, %39, %62 : vector<16x32xi32>
    %c3_i32_17 = arith.constant 3 : i32
    %64 = tpu.dynamic_rotate %38 by %c3_i32_17 dim 0 : vector<16x32xf32>, i32 -> vector<16x32xf32>
    %cst_18 = arith.constant 0.000000e+00 : f32
    %65 = vector.broadcast %cst_18 : f32 to vector<16x32xf32>
    %66 = arith.select %63, %64, %65 : vector<16x32xi1>, vector<16x32xf32>
    %67 = vector.extract_strided_slice %40 {offsets = [3, 0], sizes = [1, 32], strides = [1, 1]} : vector<16x32xf32> to vector<1x32xf32>
    %68 = vector.broadcast %67 : vector<1x32xf32> to vector<16x32xf32>
    %69 = arith.mulf %66, %68 : vector<16x32xf32>
    %70 = arith.addf %61, %69 : vector<16x32xf32>
    %c4_i32 = arith.constant 4 : i32
    %71 = vector.broadcast %c4_i32 : i32 to vector<16x32xi32>
    %72 = arith.cmpi sge, %39, %71 : vector<16x32xi32>
    %c4_i32_19 = arith.constant 4 : i32
    %73 = tpu.dynamic_rotate %38 by %c4_i32_19 dim 0 : vector<16x32xf32>, i32 -> vector<16x32xf32>
    %cst_20 = arith.constant 0.000000e+00 : f32
    %74 = vector.broadcast %cst_20 : f32 to vector<16x32xf32>
    %75 = arith.select %72, %73, %74 : vector<16x32xi1>, vector<16x32xf32>
    %76 = vector.extract_strided_slice %40 {offsets = [4, 0], sizes = [1, 32], strides = [1, 1]} : vector<16x32xf32> to vector<1x32xf32>
    %77 = vector.broadcast %76 : vector<1x32xf32> to vector<16x32xf32>
    %78 = arith.mulf %75, %77 : vector<16x32xf32>
    %79 = arith.addf %70, %78 : vector<16x32xf32>
    %c5_i32 = arith.constant 5 : i32
    %80 = vector.broadcast %c5_i32 : i32 to vector<16x32xi32>
    %81 = arith.cmpi sge, %39, %80 : vector<16x32xi32>
    %c5_i32_21 = arith.constant 5 : i32
    %82 = tpu.dynamic_rotate %38 by %c5_i32_21 dim 0 : vector<16x32xf32>, i32 -> vector<16x32xf32>
    %cst_22 = arith.constant 0.000000e+00 : f32
    %83 = vector.broadcast %cst_22 : f32 to vector<16x32xf32>
    %84 = arith.select %81, %82, %83 : vector<16x32xi1>, vector<16x32xf32>
    %85 = vector.extract_strided_slice %40 {offsets = [5, 0], sizes = [1, 32], strides = [1, 1]} : vector<16x32xf32> to vector<1x32xf32>
    %86 = vector.broadcast %85 : vector<1x32xf32> to vector<16x32xf32>
    %87 = arith.mulf %84, %86 : vector<16x32xf32>
    %88 = arith.addf %79, %87 : vector<16x32xf32>
    %c6_i32 = arith.constant 6 : i32
    %89 = vector.broadcast %c6_i32 : i32 to vector<16x32xi32>
    %90 = arith.cmpi sge, %39, %89 : vector<16x32xi32>
    %c6_i32_23 = arith.constant 6 : i32
    %91 = tpu.dynamic_rotate %38 by %c6_i32_23 dim 0 : vector<16x32xf32>, i32 -> vector<16x32xf32>
    %cst_24 = arith.constant 0.000000e+00 : f32
    %92 = vector.broadcast %cst_24 : f32 to vector<16x32xf32>
    %93 = arith.select %90, %91, %92 : vector<16x32xi1>, vector<16x32xf32>
    %94 = vector.extract_strided_slice %40 {offsets = [6, 0], sizes = [1, 32], strides = [1, 1]} : vector<16x32xf32> to vector<1x32xf32>
    %95 = vector.broadcast %94 : vector<1x32xf32> to vector<16x32xf32>
    %96 = arith.mulf %93, %95 : vector<16x32xf32>
    %97 = arith.addf %88, %96 : vector<16x32xf32>
    %c7_i32 = arith.constant 7 : i32
    %98 = vector.broadcast %c7_i32 : i32 to vector<16x32xi32>
    %99 = arith.cmpi sge, %39, %98 : vector<16x32xi32>
    %c7_i32_25 = arith.constant 7 : i32
    %100 = tpu.dynamic_rotate %38 by %c7_i32_25 dim 0 : vector<16x32xf32>, i32 -> vector<16x32xf32>
    %cst_26 = arith.constant 0.000000e+00 : f32
    %101 = vector.broadcast %cst_26 : f32 to vector<16x32xf32>
    %102 = arith.select %99, %100, %101 : vector<16x32xi1>, vector<16x32xf32>
    %103 = vector.extract_strided_slice %40 {offsets = [7, 0], sizes = [1, 32], strides = [1, 1]} : vector<16x32xf32> to vector<1x32xf32>
    %104 = vector.broadcast %103 : vector<1x32xf32> to vector<16x32xf32>
    %105 = arith.mulf %102, %104 : vector<16x32xf32>
    %106 = arith.addf %97, %105 : vector<16x32xf32>
    %c8_i32 = arith.constant 8 : i32
    %107 = vector.broadcast %c8_i32 : i32 to vector<16x32xi32>
    %108 = arith.cmpi sge, %39, %107 : vector<16x32xi32>
    %c8_i32_27 = arith.constant 8 : i32
    %109 = tpu.dynamic_rotate %38 by %c8_i32_27 dim 0 : vector<16x32xf32>, i32 -> vector<16x32xf32>
    %cst_28 = arith.constant 0.000000e+00 : f32
    %110 = vector.broadcast %cst_28 : f32 to vector<16x32xf32>
    %111 = arith.select %108, %109, %110 : vector<16x32xi1>, vector<16x32xf32>
    %112 = vector.extract_strided_slice %40 {offsets = [8, 0], sizes = [1, 32], strides = [1, 1]} : vector<16x32xf32> to vector<1x32xf32>
    %113 = vector.broadcast %112 : vector<1x32xf32> to vector<16x32xf32>
    %114 = arith.mulf %111, %113 : vector<16x32xf32>
    %115 = arith.addf %106, %114 : vector<16x32xf32>
    %c9_i32 = arith.constant 9 : i32
    %116 = vector.broadcast %c9_i32 : i32 to vector<16x32xi32>
    %117 = arith.cmpi sge, %39, %116 : vector<16x32xi32>
    %c9_i32_29 = arith.constant 9 : i32
    %118 = tpu.dynamic_rotate %38 by %c9_i32_29 dim 0 : vector<16x32xf32>, i32 -> vector<16x32xf32>
    %cst_30 = arith.constant 0.000000e+00 : f32
    %119 = vector.broadcast %cst_30 : f32 to vector<16x32xf32>
    %120 = arith.select %117, %118, %119 : vector<16x32xi1>, vector<16x32xf32>
    %121 = vector.extract_strided_slice %40 {offsets = [9, 0], sizes = [1, 32], strides = [1, 1]} : vector<16x32xf32> to vector<1x32xf32>
    %122 = vector.broadcast %121 : vector<1x32xf32> to vector<16x32xf32>
    %123 = arith.mulf %120, %122 : vector<16x32xf32>
    %124 = arith.addf %115, %123 : vector<16x32xf32>
    %c10_i32 = arith.constant 10 : i32
    %125 = vector.broadcast %c10_i32 : i32 to vector<16x32xi32>
    %126 = arith.cmpi sge, %39, %125 : vector<16x32xi32>
    %c10_i32_31 = arith.constant 10 : i32
    %127 = tpu.dynamic_rotate %38 by %c10_i32_31 dim 0 : vector<16x32xf32>, i32 -> vector<16x32xf32>
    %cst_32 = arith.constant 0.000000e+00 : f32
    %128 = vector.broadcast %cst_32 : f32 to vector<16x32xf32>
    %129 = arith.select %126, %127, %128 : vector<16x32xi1>, vector<16x32xf32>
    %130 = vector.extract_strided_slice %40 {offsets = [10, 0], sizes = [1, 32], strides = [1, 1]} : vector<16x32xf32> to vector<1x32xf32>
    %131 = vector.broadcast %130 : vector<1x32xf32> to vector<16x32xf32>
    %132 = arith.mulf %129, %131 : vector<16x32xf32>
    %133 = arith.addf %124, %132 : vector<16x32xf32>
    %c11_i32 = arith.constant 11 : i32
    %134 = vector.broadcast %c11_i32 : i32 to vector<16x32xi32>
    %135 = arith.cmpi sge, %39, %134 : vector<16x32xi32>
    %c11_i32_33 = arith.constant 11 : i32
    %136 = tpu.dynamic_rotate %38 by %c11_i32_33 dim 0 : vector<16x32xf32>, i32 -> vector<16x32xf32>
    %cst_34 = arith.constant 0.000000e+00 : f32
    %137 = vector.broadcast %cst_34 : f32 to vector<16x32xf32>
    %138 = arith.select %135, %136, %137 : vector<16x32xi1>, vector<16x32xf32>
    %139 = vector.extract_strided_slice %40 {offsets = [11, 0], sizes = [1, 32], strides = [1, 1]} : vector<16x32xf32> to vector<1x32xf32>
    %140 = vector.broadcast %139 : vector<1x32xf32> to vector<16x32xf32>
    %141 = arith.mulf %138, %140 : vector<16x32xf32>
    %142 = arith.addf %133, %141 : vector<16x32xf32>
    %c12_i32 = arith.constant 12 : i32
    %143 = vector.broadcast %c12_i32 : i32 to vector<16x32xi32>
    %144 = arith.cmpi sge, %39, %143 : vector<16x32xi32>
    %c12_i32_35 = arith.constant 12 : i32
    %145 = tpu.dynamic_rotate %38 by %c12_i32_35 dim 0 : vector<16x32xf32>, i32 -> vector<16x32xf32>
    %cst_36 = arith.constant 0.000000e+00 : f32
    %146 = vector.broadcast %cst_36 : f32 to vector<16x32xf32>
    %147 = arith.select %144, %145, %146 : vector<16x32xi1>, vector<16x32xf32>
    %148 = vector.extract_strided_slice %40 {offsets = [12, 0], sizes = [1, 32], strides = [1, 1]} : vector<16x32xf32> to vector<1x32xf32>
    %149 = vector.broadcast %148 : vector<1x32xf32> to vector<16x32xf32>
    %150 = arith.mulf %147, %149 : vector<16x32xf32>
    %151 = arith.addf %142, %150 : vector<16x32xf32>
    %c13_i32 = arith.constant 13 : i32
    %152 = vector.broadcast %c13_i32 : i32 to vector<16x32xi32>
    %153 = arith.cmpi sge, %39, %152 : vector<16x32xi32>
    %c13_i32_37 = arith.constant 13 : i32
    %154 = tpu.dynamic_rotate %38 by %c13_i32_37 dim 0 : vector<16x32xf32>, i32 -> vector<16x32xf32>
    %cst_38 = arith.constant 0.000000e+00 : f32
    %155 = vector.broadcast %cst_38 : f32 to vector<16x32xf32>
    %156 = arith.select %153, %154, %155 : vector<16x32xi1>, vector<16x32xf32>
    %157 = vector.extract_strided_slice %40 {offsets = [13, 0], sizes = [1, 32], strides = [1, 1]} : vector<16x32xf32> to vector<1x32xf32>
    %158 = vector.broadcast %157 : vector<1x32xf32> to vector<16x32xf32>
    %159 = arith.mulf %156, %158 : vector<16x32xf32>
    %160 = arith.addf %151, %159 : vector<16x32xf32>
    %c14_i32 = arith.constant 14 : i32
    %161 = vector.broadcast %c14_i32 : i32 to vector<16x32xi32>
    %162 = arith.cmpi sge, %39, %161 : vector<16x32xi32>
    %c14_i32_39 = arith.constant 14 : i32
    %163 = tpu.dynamic_rotate %38 by %c14_i32_39 dim 0 : vector<16x32xf32>, i32 -> vector<16x32xf32>
    %cst_40 = arith.constant 0.000000e+00 : f32
    %164 = vector.broadcast %cst_40 : f32 to vector<16x32xf32>
    %165 = arith.select %162, %163, %164 : vector<16x32xi1>, vector<16x32xf32>
    %166 = vector.extract_strided_slice %40 {offsets = [14, 0], sizes = [1, 32], strides = [1, 1]} : vector<16x32xf32> to vector<1x32xf32>
    %167 = vector.broadcast %166 : vector<1x32xf32> to vector<16x32xf32>
    %168 = arith.mulf %165, %167 : vector<16x32xf32>
    %169 = arith.addf %160, %168 : vector<16x32xf32>
    %c15_i32 = arith.constant 15 : i32
    %170 = vector.broadcast %c15_i32 : i32 to vector<16x32xi32>
    %171 = arith.cmpi sge, %39, %170 : vector<16x32xi32>
    %c15_i32_41 = arith.constant 15 : i32
    %172 = tpu.dynamic_rotate %38 by %c15_i32_41 dim 0 : vector<16x32xf32>, i32 -> vector<16x32xf32>
    %cst_42 = arith.constant 0.000000e+00 : f32
    %173 = vector.broadcast %cst_42 : f32 to vector<16x32xf32>
    %174 = arith.select %171, %172, %173 : vector<16x32xi1>, vector<16x32xf32>
    %175 = vector.extract_strided_slice %40 {offsets = [15, 0], sizes = [1, 32], strides = [1, 1]} : vector<16x32xf32> to vector<1x32xf32>
    %176 = vector.broadcast %175 : vector<1x32xf32> to vector<16x32xf32>
    %177 = arith.mulf %174, %176 : vector<16x32xf32>
    %178 = arith.addf %169, %177 : vector<16x32xf32>
    %179 = vector.broadcast %6 : vector<1x32xf32> to vector<16x32xf32>
    %180 = arith.mulf %38, %179 : vector<16x32xf32>
    %181 = arith.addf %178, %180 : vector<16x32xf32>
    %182 = arith.mulf %181, %35 : vector<16x32xf32>
    %183 = arith.truncf %182 : vector<16x32xf32> to vector<16x32xbf16>
    %c0_43 = arith.constant 0 : index
    %c0_44 = arith.constant 0 : index
    %184 = vector.load %arg3[%c0_43, %c0_44] : memref<32x16xbf16, #tpu.memory_space<vmem>>, vector<32x16xbf16>
    %cst_45 = arith.constant dense<0.000000e+00> : vector<16x16xf32>
    %185 = tpu.matmul %183, %184, %cst_45 {dimension_numbers = #tpu.dot_dimension_numbers<[1], [0], [0], [1], [0, 0, 1, 1], [], []>} : vector<16x32xbf16>, vector<32x16xbf16>, vector<16x16xf32> -> vector<16x16xf32>
    %186 = vector.broadcast %7 : vector<1x16xf32> to vector<16x16xf32>
    %187 = arith.addf %185, %186 : vector<16x16xf32>
    %c0_46 = arith.constant 0 : index
    %c0_47 = arith.constant 0 : index
    %188 = vector.load %arg6[%c0_46, %c0_47] : memref<16x16xf32, #tpu.memory_space<vmem>>, vector<16x16xf32>
    tpu.vector_store %arg6[%c0_46, %c0_47], %187 {strides = array<i32>} : memref<16x16xf32, #tpu.memory_space<vmem>>, vector<16x16xf32>,
    return
  }
  func.func @transform_0(%arg0: i32) -> (i32, i32) {
    %c0_i32 = arith.constant 0 : i32
    %c0_i32_0 = arith.constant 0 : i32
    return %arg0, %c0_i32 : i32, i32
  }
  func.func @transform_1(%arg0: i32) -> (i32, i32) {
    %c0_i32 = arith.constant 0 : i32
    %c0_i32_0 = arith.constant 0 : i32
    %c0_i32_1 = arith.constant 0 : i32
    return %c0_i32, %c0_i32_0 : i32, i32
  }
  func.func @transform_2(%arg0: i32) -> (i32, i32) {
    %c0_i32 = arith.constant 0 : i32
    %c0_i32_0 = arith.constant 0 : i32
    %c0_i32_1 = arith.constant 0 : i32
    return %c0_i32, %c0_i32_0 : i32, i32
  }
  func.func @transform_3(%arg0: i32) -> (i32, i32) {
    %c0_i32 = arith.constant 0 : i32
    %c0_i32_0 = arith.constant 0 : i32
    %c0_i32_1 = arith.constant 0 : i32
    return %c0_i32, %c0_i32_0 : i32, i32
  }
  func.func @transform_4(%arg0: i32) -> (i32, i32) {
    %c0_i32 = arith.constant 0 : i32
    %c0_i32_0 = arith.constant 0 : i32
    %c0_i32_1 = arith.constant 0 : i32
    return %c0_i32, %c0_i32_0 : i32, i32
  }
  func.func @transform_5(%arg0: i32) -> (i32, i32) {
    %c0_i32 = arith.constant 0 : i32
    %c0_i32_0 = arith.constant 0 : i32
    return %arg0, %c0_i32 : i32, i32
  }
}

</mosaic_0001>

<bundles_post_ra>
// kernel: tpu_custom_call.1
= control target key start
LH: loop header
LB: loop body
LE: loop exit
PB: predicated region body
PF: predicated region fallthrough
CT: control target
= control target key end

     0   :  { %s937_s18 = smov 0   ;;  %s1215_s0 = inlined_call_operand.vmem [shape: f32[32,16], index: 0, kind: input, shape index: {}]   ;;  %s1216_s1 = inlined_call_operand.vmem [shape: bf16[16,96], index: 1, kind: input, shape index: {}]   ;;  %s1217_s2 = inlined_call_operand.vmem [shape: bf16[32,16], index: 2, kind: input, shape index: {}]   ;;  %s1218_s3 = inlined_call_operand.vmem [shape: f32[16,32], index: 3, kind: input, shape index: {}]   ;;  %s1219_s4 = inlined_call_operand.vmem [shape: f32[8,96], index: 4, kind: input, shape index: {}]   ;;  %s1220_s5 = inlined_call_operand.vmem [shape: f32[32,16], index: 5, kind: output, shape index: {}]  }
   0x1 LB: > { %s845_s19 = sadd.s32 4294967295, %s901_s18   ;;  %p849_p0 = scmp.ge.s32.totalorder %s901_s18, 1  ;;  %s901_s18 = sphi %s937_s18, %s15_s18  }
   0x2   : > { %p188_p1 = scmp.lt.s32.totalorder %s901_s18, 3 }
   0x4   : > { %p189_p2 = pnand %p849_p0, %p188_p1 }
   0x5   : > { %v892_v0 = vld [vmem:[%s1216_s1] sm:$0xff] (!%p189_p2)   ;;  %v903_v1 = vmov (!%p189_p2), 0.0   ;;  %s850_s22 = sshll.u32 (!%p189_p2), %s845_s19, 1  ;;  %vm904_vm0 = vmmov (!%p189_p2), 0   ;;  %vm245_vm1 = vcmask (!%p189_p2), 130048   ;;  %v235_v5 = vlaneseq (!%p189_p2)  ;;  %s905_s29 = smov (!%p189_p2), 32  }
   0x6   : > { %192 = sbr.rel (%p189_p2) target bundleno = 995 (0x3e3), region = 40  ;;  %866 = vmatprep.subr.bf16.mxu0 (!%p189_p2), %v903_v1  ;;  %872 = vmatprep.subr.bf16.mxu1 (!%p189_p2), %v903_v1  ;;  %p217_p3 = scmp.lt.s32.totalorder (!%p189_p2), %s850_s22, 3  ;;  %v967_v8 = vld [vmem:[%s1219_s4] sm:$0xff] (!%p189_p2)  ;;  %v1022_v49 = vld [vmem:[%s1218_s3 + $0x8] sm:$0xff] (!%p189_p2) }
   0x7   : > { %867 = vmatpush3.bf16.msra.mxu0 (!%p189_p2), %v892_v0  ;;  %868 = vmatprep.mubr.msk.bf16.mxu0 (!%p189_p2), %vm904_vm0, %v903_v1  ;;  %v961_v6 = vshrl.u32 (!%p189_p2), %v235_v5, 7  ;;  %v1012_v45 = vld [vmem:[%s1218_s3] sm:$0xff] (!%p189_p2)  ;;  %s906_s7 = smov (!%p189_p2), 64  }
   0x8   : > { %876 = vmatprep.mubr.msk.bf16.mxu1 (!%p189_p2), %vm904_vm0, %v903_v1 }
   0x9   : > { %v237_v7 = vsub.s32 (!%p189_p2), 0, %v961_v6  ;;  %v971_v10 = vsub.s32 (!%p189_p2), 3, %v961_v6  ;;  %v974_v12 = vsub.s32 (!%p189_p2), 2, %v961_v6  ;;  %v977_v16 = vsub.s32 (!%p189_p2), 1, %v961_v6 }
   0xa   : > { %vm293_vm2 = vcmp.ge.s32.totalorder (!%p189_p2), %v961_v6, 1  ;;  %vm297_vm3 = vcmp.lt.s32.totalorder (!%p189_p2), %v961_v6, 1  ;;  %vm306_vm4 = vcmp.lt.s32.totalorder (!%p189_p2), %v961_v6, 2  ;;  %vm302_vm5 = vcmp.ge.s32.totalorder (!%p189_p2), %v961_v6, 2 }
   0xb   : > { %v238_v9 = vrot.slane (!%p189_p2), %v967_v8, %v237_v7  ;;  %v314_v17 = vrot.slane (!%p189_p2), %v967_v8, %v971_v10  ;;  %v320_v20 = vrot.slane (!%p189_p2), %v967_v8, %v974_v12  ;;  %v328_v25 = vrot.slane (!%p189_p2), %v967_v8, %v977_v16 }
   0xc   : > { %v990_v26 = vsub.s32 (!%p189_p2), 4, %v961_v6  ;;  %v354_v47 = vrot.slane (!%p189_p2), %v1012_v45, %v237_v7  ;;  %v545_v51 = vrot.slane (!%p189_p2), %v1022_v49, %v237_v7  ;;  %v1037_v55 = vrot.slane (!%p189_p2), %v1022_v49, %v977_v16 }
   0xd   : > { %s1222_s22 = smov (!%p217_p3, %s850_s22), 3  ;;  %v1043_v57 = vrot.slane %v1022_v49, %v974_v12  ;;  %v1049_v59 = vrot.slane %v1022_v49, %v971_v10  ;;  %vm417_vm6 = vcmp.lt.s32.totalorder %v961_v6, 3  ;;  %vm413_vm7 = vcmp.ge.s32.totalorder %v961_v6, 3 }
   0xe   : > { %s851_s23 = sshll.u32 %s1222_s22, 3  ;;  %v336_v41 = vrot.slane %v967_v8, %v990_v26  ;;  %v546_v54 = vmul.f32 0.0, %v545_v51  ;;  %v566_v56 = vmul.f32 0.0, %v1037_v55  ;;  %v1055_v61 = vrot.slane %v1022_v49, %v990_v26 }
   0xf   : > { %s220_s26 = scalar_lea.vmem %s1215_s0, %s851_s23  ;;  %v586_v58 = vmul.f32 0.0, %v1043_v57  ;;  %v606_v60 = vmul.f32 0.0, %v1049_v59  ;;  %vm442_vm8 = vcmp.lt.s32.totalorder %v961_v6, 4  ;;  %vm438_vm9 = vcmp.ge.s32.totalorder %v961_v6, 4  ;;  %s226_s16 = scalar_lea.vmem %s1220_s5, %s851_s23 }
  0x10   : > { %v230_v2 = vld [vmem:[%s220_s26] sm:$0xff]  ;;  %v231_v3 = vld [vmem:[%s220_s26 + $0x8] sm:$0xff]  ;;  %v626_v62 = vmul.f32 0.0, %v1055_v61  ;;  %vm467_vm10 = vcmp.lt.s32.totalorder %v961_v6, 5  ;;  %vm463_vm11 = vcmp.ge.s32.totalorder %v961_v6, 5  ;;  %vm492_vm12 = vcmp.lt.s32.totalorder %v961_v6, 6 }
  0x11   : > { %v232_v4 = vpack.c.bf16 %v231_v3, %v230_v2  ;;  %v378_v3 = vrot.slane %v1012_v45, %v977_v16  ;;  %vm488_vm13 = vcmp.ge.s32.totalorder %v961_v6, 6  ;;  %vm517_vm14 = vcmp.lt.s32.totalorder %v961_v6, 7 }
  0x12   : > { %vm513_vm15 = vcmp.ge.s32.totalorder %v961_v6, 7 }
  0x13   : > { %869 = vmatmul.mubr.msk.bf16.vlgmr.msra.gmra.mrb[0].mxu0 %vm245_vm1, %v232_v4 }
  0xe6   : > { %v283_v11 = vpop.f32.mrb[0].mxu0 }
  0xe7   : > { %v284_v13 = vadd.f32 %v283_v11, %v238_v9  ;;  %v870_v14 = vpop.f32.mrb[1].mxu0 }
  0xe8   : > { %v286_v15 = vpop.f32.mrb[2].mxu0 }
  0xe9   : > { %v287_v18 = vadd.f32 %v286_v15, %v238_v9  ;;  %v871_v19 = vpop.f32.mrb[3].mxu0  ;;  %v295_v21 = vrot.slane %v284_v13, 7  ;;  %v304_v22 = vrot.slane %v284_v13, 6  ;;  %v315_v35 = vmul.f32 %v314_v17, %v284_v13 }
  0xeb   : > { %v296_v23 = vrot.slane %v287_v18, 7  ;;  %v305_v24 = vrot.slane %v287_v18, 6  ;;  %v316_v32 = vmul.f32 %v314_v17, %v287_v18  ;;  %v400_v18 = vrot.slane %v1012_v45, %v974_v12 }
  0xed   : > { %v298_v27 = vsel %vm297_vm3, %v295_v21, %v296_v23  ;;  %v299_v28 = vsel %vm297_vm3, %v296_v23, %v295_v21  ;;  %v308_v29 = vsel %vm306_vm4, %v305_v24, %v304_v22  ;;  %v307_v30 = vsel %vm306_vm4, %v304_v22, %v305_v24 }
  0xee   : > { %v300_v31 = vsel %vm293_vm2, %v299_v28, 0.0  ;;  %v322_v33 = vmul.f32 %v320_v20, %v298_v27  ;;  %v309_v34 = vsel %vm302_vm5, %v308_v29, 0.0  ;;  %v330_v38 = vmul.f32 %v328_v25, %v307_v30 }
  0xef   : > { %v321_v36 = vmul.f32 %v320_v20, %v300_v31  ;;  %v329_v40 = vmul.f32 %v328_v25, %v309_v34  ;;  %v425_v25 = vrot.slane %v1012_v45, %v971_v10  ;;  %v450_v10 = vrot.slane %v1012_v45, %v990_v26 }
  0xf0   : > { %v324_v37 = vadd.f32 %v322_v33, %v316_v32  ;;  %v1116_v34 = vsub.s32 5, %v961_v6 }
  0xf1   : > { %v323_v39 = vadd.f32 %v321_v36, %v315_v35 }
  0xf2   : > { %v332_v42 = vadd.f32 %v330_v38, %v324_v37 }
  0xf3   : > { %v331_v43 = vadd.f32 %v329_v40, %v323_v39 }
  0xf4   : > { %v1014_v46 = vadd.f32 %v336_v41, %v332_v42  ;;  %v1132_v42 = vsub.s32 6, %v961_v6 }
  0xf5   : > { %v1006_v44 = vadd.f32 %v336_v41, %v331_v43  ;;  %v475_v41 = vrot.slane %v1012_v45, %v1116_v34 }
  0xf7   : > { %341 = vrot.lane.b32.xlu0 %v1006_v44, %s905_s29 }
  0xfb   : > { %343 = vrot.lane.b32.xlu0 %v1014_v46, %s905_s29 }
  0xff   : > { %356 = vrot.lane.b32.xlu0 %v354_v47, %s906_s7 }
 0x169   : > { %v342_v48 = vpop.permute.xlu0 %341 }
 0x16a   : > { %v1025_v50 = vmul.f32 %v342_v48, %v1006_v44 }
 0x16c   : > { %363 = vrot.lane.b32.xlu1 %v1025_v50, %s906_s7 }
 0x16d   : > { %v344_v52 = vpop.permute.xlu0 %343 }
 0x16e   : > { %v1031_v53 = vmul.f32 %v344_v52, %v1014_v46 }
 0x170   : > { %365 = vrot.lane.b32.xlu1 %v1031_v53, %s906_s7 }
 0x174   : > { %550 = vrot.lane.b32.xlu1 %v546_v54, %s906_s7 }
 0x178   : > { %570 = vrot.lane.b32.xlu1 %v566_v56, %s906_s7 }
 0x17c   : > { %590 = vrot.lane.b32.xlu1 %v586_v58, %s906_s7  ;;  %v500_v58 = vrot.slane %v1012_v45, %v1132_v42 }
 0x180   : > { %610 = vrot.lane.b32.xlu1 %v606_v60, %s906_s7  ;;  %v524_v60 = vsub.s32 7, %v961_v6 }
 0x184   : > { %630 = vrot.lane.b32.xlu1 %v626_v62, %s906_s7 }
 0x1de   : > { %v1060_v63 = vpop.permute.xlu1 %363 }
 0x1df   : > { %v547_v0 = vmul.f32 %v545_v51, %v1060_v63  ;;  %v369_v4 = vrot.slane %v1060_v63, 7  ;;  %v391_v7 = vrot.slane %v1060_v63, 6  ;;  %v415_v21 = vrot.slane %v1060_v63, 5 }
 0x1e0   : > { %v440_v29 = vrot.slane %v1060_v63, 4  ;;  %v465_v37 = vrot.slane %v1060_v63, 3  ;;  %v490_v48 = vrot.slane %v1060_v63, 2 }
 0x1e1   : > { %552 = vrot.lane.b32.xlu0 %v547_v0, %s906_s7 }
 0x1e2   : > { %v1064_v2 = vpop.permute.xlu1 %365 }
 0x1e3   : > { %v370_v5 = vrot.slane %v1064_v2, 7  ;;  %v392_v9 = vrot.slane %v1064_v2, 6  ;;  %v416_v15 = vrot.slane %v1064_v2, 5  ;;  %v441_v12 = vrot.slane %v1064_v2, 4 }
 0x1e4   : > { %v466_v32 = vrot.slane %v1064_v2, 3  ;;  %v491_v39 = vrot.slane %v1064_v2, 2  ;;  %v516_v54 = vrot.slane %v1064_v2, 1 }
 0x1e5   : > { %v371_v11 = vsel %vm297_vm3, %v369_v4, %v370_v5  ;;  %v1076_v13 = vsel %vm297_vm3, %v370_v5, %v369_v4  ;;  %v1080_v14 = vsel %vm306_vm4, %v392_v9, %v391_v7  ;;  %v393_v20 = vsel %vm306_vm4, %v391_v7, %v392_v9 }
 0x1e6   : > { %v380_v16 = vmul.f32 %v378_v3, %v371_v11  ;;  %v373_v17 = vsel %vm293_vm2, %v1076_v13, 0.0  ;;  %v395_v22 = vsel %vm302_vm5, %v1080_v14, 0.0  ;;  %v1098_v23 = vsel %vm417_vm6, %v416_v15, %v415_v21 }
 0x1e7   : > { %v379_v19 = vmul.f32 %v378_v3, %v373_v17  ;;  %v402_v24 = vmul.f32 %v400_v18, %v393_v20  ;;  %v401_v27 = vmul.f32 %v400_v18, %v395_v22  ;;  %v418_v28 = vsel %vm417_vm6, %v415_v21, %v416_v15 }
 0x1e8   : > { %385 = vrot.lane.b32.xlu0 %v380_v16, %s906_s7  ;;  %v420_v30 = vsel %vm413_vm7, %v1098_v23, 0.0  ;;  %v1109_v31 = vsel %vm442_vm8, %v441_v12, %v440_v29  ;;  %v427_v33 = vmul.f32 %v425_v25, %v418_v28  ;;  %v443_v36 = vsel %vm442_vm8, %v440_v29, %v441_v12 }
 0x1e9   : > { %383 = vrot.lane.b32.xlu1 %v379_v19, %s906_s7  ;;  %v426_v35 = vmul.f32 %v425_v25, %v420_v30  ;;  %v445_v38 = vsel %vm438_vm9, %v1109_v31, 0.0  ;;  %v1125_v26 = vsel %vm467_vm10, %v466_v32, %v465_v37  ;;  %v452_v40 = vmul.f32 %v450_v10, %v443_v36  ;;  %v894_v30 = vld [vmem:[%s1217_s2 + $0x8] sm:$0xff]  }
 0x1ea   : > { %v451_v43 = vmul.f32 %v450_v10, %v445_v38  ;;  %v468_v47 = vsel %vm467_vm10, %v465_v37, %v466_v32  ;;  %v470_v51 = vsel %vm463_vm11, %v1125_v26, 0.0  ;;  %v494_v52 = vsel %vm492_vm12, %v491_v39, %v490_v48 }
 0x1eb   : > { %v477_v56 = vmul.f32 %v475_v41, %v468_v47  ;;  %v476_v62 = vmul.f32 %v475_v41, %v470_v51  ;;  %v493_v0 = vsel %vm492_vm12, %v490_v48, %v491_v39  ;;  %v515_v3 = vrot.slane %v1060_v63, 1 }
 0x1ec   : > { %407 = vrot.lane.b32.xlu0 %v402_v24, %s906_s7  ;;  %v495_v4 = vsel %vm488_vm13, %v494_v52, 0.0  ;;  %v292_v5 = vadd.s32 8, %v961_v6  ;;  %v502_v7 = vmul.f32 %v500_v58, %v493_v0  ;;  %v525_v9 = vrot.slane %v1012_v45, %v524_v60 }
 0x1ed   : > { %405 = vrot.lane.b32.xlu1 %v401_v27, %s906_s7  ;;  %v519_v2 = vsel %vm517_vm14, %v516_v54, %v515_v3  ;;  %v501_v11 = vmul.f32 %v500_v58, %v495_v4  ;;  %v518_v15 = vsel %vm517_vm14, %v515_v3, %v516_v54  ;;  %v645_v19 = vrot.slane %v1022_v49, %v1116_v34 }
 0x1ee   : > { %v520_v16 = vsel %vm513_vm15, %v519_v2, 0.0  ;;  %vm559_vm0 = vcmp.ge.s32.totalorder %v292_v5, 9  ;;  %v527_v63 = vmul.f32 %v525_v9, %v518_v15  ;;  %vm579_vm2 = vcmp.ge.s32.totalorder %v292_v5, 10 }
 0x1ef   : > { %v526_v17 = vmul.f32 %v525_v9, %v520_v16  ;;  %v561_v18 = vsel %vm559_vm0, %v1076_v13, 0.0  ;;  %v646_v6 = vmul.f32 0.0, %v645_v19  ;;  %v581_v20 = vsel %vm579_vm2, %v1080_v14, 0.0 }
 0x1f0   : > { %432 = vrot.lane.b32.xlu0 %v427_v33, %s906_s7  ;;  %v567_v45 = vmul.f32 %v1037_v55, %v561_v18  ;;  %v665_v21 = vrot.slane %v1022_v49, %v1132_v42  ;;  %vm599_vm3 = vcmp.ge.s32.totalorder %v292_v5, 11  ;;  %v587_v22 = vmul.f32 %v1043_v57, %v581_v20 }
 0x1f1   : > { %430 = vrot.lane.b32.xlu1 %v426_v35, %s906_s7  ;;  %v601_v12 = vsel %vm599_vm3, %v1098_v23, 0.0  ;;  %v685_v24 = vrot.slane %v1022_v49, %v524_v60  ;;  %vm619_vm4 = vcmp.ge.s32.totalorder %v292_v5, 12  ;;  %vm639_vm5 = vcmp.ge.s32.totalorder %v292_v5, 13 }
 0x1f2   : > { %v666_v13 = vmul.f32 0.0, %v665_v21  ;;  %v607_v14 = vmul.f32 %v1049_v59, %v601_v12  ;;  %v621_v25 = vsel %vm619_vm4, %v1109_v31, 0.0  ;;  %v701_v57 = vrot.slane %v967_v8, %v1116_v34  ;;  %v357_v34 = vpop.permute.xlu0 %356 }
 0x1f3   : > { %v686_v55 = vmul.f32 0.0, %v685_v24  ;;  %v627_v49 = vmul.f32 %v1055_v61, %v621_v25  ;;  %v641_v23 = vsel %vm639_vm5, %v1125_v26, 0.0  ;;  %vm659_vm6 = vcmp.ge.s32.totalorder %v292_v5, 14  ;;  %v893_v61 = vld [vmem:[%s1217_s2] sm:$0xff]  }
 0x1f4   : > { %457 = vrot.lane.b32.xlu0 %v452_v40, %s906_s7  ;;  %v647_v59 = vmul.f32 %v645_v19, %v641_v23  ;;  %v661_v27 = vsel %vm659_vm6, %v494_v52, 0.0  ;;  %vm679_vm7 = vcmp.ge.s32.totalorder %v292_v5, 15  ;;  %873 = vmatpush3.bf16.msra.mxu1 %v893_v61  ;;  %vm742_vm8 = vcmask 261120  }
 0x1f5   : > { %455 = vrot.lane.b32.xlu1 %v451_v43, %s906_s7  ;;  %v667_v28 = vmul.f32 %v665_v21, %v661_v27  ;;  %v681_v29 = vsel %vm679_vm7, %v519_v2, 0.0  ;;  %874 = vmatprep.subr.bf16.mxu1 %v903_v1  ;;  %v359_v1 = vmul.f32 %v357_v34, %v1025_v50 }
 0x1f6   : > { %v687_v31 = vmul.f32 %v685_v24, %v681_v29 }
 0x1f8   : > { %482 = vrot.lane.b32.xlu0 %v477_v56, %s906_s7  ;;  %875 = vmatpush3.bf16.msra.mxu1 %v894_v30  ;;  %v360_v56 = vmul.f32 %v357_v34, %v1031_v53 }
 0x1f9   : > { %480 = vrot.lane.b32.xlu1 %v476_v62, %s906_s7 }
 0x1fc   : > { %507 = vrot.lane.b32.xlu0 %v502_v7, %s906_s7 }
 0x1fd   : > { %505 = vrot.lane.b32.xlu1 %v501_v11, %s906_s7 }
 0x200   : > { %532 = vrot.lane.b32.xlu0 %v527_v63, %s906_s7 }
 0x201   : > { %530 = vrot.lane.b32.xlu1 %v526_v17, %s906_s7 }
 0x204   : > { %572 = vrot.lane.b32.xlu0 %v567_v45, %s906_s7 }
 0x205   : > { %650 = vrot.lane.b32.xlu1 %v646_v6, %s906_s7 }
 0x208   : > { %592 = vrot.lane.b32.xlu0 %v587_v22, %s906_s7 }
 0x209   : > { %670 = vrot.lane.b32.xlu1 %v666_v13, %s906_s7 }
 0x20c   : > { %612 = vrot.lane.b32.xlu0 %v607_v14, %s906_s7 }
 0x20d   : > { %690 = vrot.lane.b32.xlu1 %v686_v55, %s906_s7 }
 0x210   : > { %632 = vrot.lane.b32.xlu0 %v627_v49, %s906_s7 }
 0x211   : > { %703 = vrot.lane.b32.xlu1 %v701_v57, %s906_s7 }
 0x214   : > { %652 = vrot.lane.b32.xlu0 %v647_v59, %s906_s7 }
 0x215   : > { %712 = vrot.lane.b32.xlu1 %v1014_v46, %s906_s7  ;;  %v551_v46 = vpop.permute.xlu1 %550 }
 0x218   : > { %672 = vrot.lane.b32.xlu0 %v667_v28, %s906_s7 }
 0x219   : > { %v571_v32 = vpop.permute.xlu1 %570 }
 0x21c   : > { %692 = vrot.lane.b32.xlu0 %v687_v31, %s906_s7 }
 0x21d   : > { %v591_v33 = vpop.permute.xlu1 %590 }
 0x220   : > { %710 = vrot.lane.b32.xlu0 %v1006_v44, %s906_s7 }
 0x221   : > { %v611_v10 = vpop.permute.xlu1 %610 }
 0x225   : > { %v631_v35 = vpop.permute.xlu1 %630 }
 0x253   : > { %v553_v36 = vpop.permute.xlu0 %552 }
 0x25a   : > { %v386_v37 = vpop.permute.xlu0 %385 }
 0x25b   : > { %v384_v38 = vpop.permute.xlu1 %383  ;;  %v390_v62 = vadd.f32 %v386_v37, %v360_v56 }
 0x25c   : > { %v389_v48 = vadd.f32 %v384_v38, %v359_v1 }
 0x25e   : > { %v408_v26 = vpop.permute.xlu0 %407 }
 0x25f   : > { %v406_v39 = vpop.permute.xlu1 %405  ;;  %v412_v4 = vadd.f32 %v408_v26, %v390_v62 }
 0x260   : > { %v411_v51 = vadd.f32 %v406_v39, %v389_v48 }
 0x262   : > { %v433_v40 = vpop.permute.xlu0 %432 }
 0x263   : > { %v431_v41 = vpop.permute.xlu1 %430  ;;  %v437_v7 = vadd.f32 %v433_v40, %v412_v4 }
 0x264   : > { %v436_v54 = vadd.f32 %v431_v41, %v411_v51 }
 0x266   : > { %v458_v43 = vpop.permute.xlu0 %457 }
 0x267   : > { %v456_v47 = vpop.permute.xlu1 %455  ;;  %v462_v15 = vadd.f32 %v458_v43, %v437_v7 }
 0x268   : > { %v461_v58 = vadd.f32 %v456_v47, %v436_v54 }
 0x26a   : > { %v483_v44 = vpop.permute.xlu0 %482 }
 0x26b   : > { %v481_v52 = vpop.permute.xlu1 %480  ;;  %v487_v17 = vadd.f32 %v483_v44, %v462_v15 }
 0x26c   : > { %v486_v3 = vadd.f32 %v481_v52, %v461_v58 }
 0x26e   : > { %v508_v60 = vpop.permute.xlu0 %507 }
 0x26f   : > { %v506_v0 = vpop.permute.xlu1 %505  ;;  %v512_v6 = vadd.f32 %v508_v60, %v487_v17 }
 0x270   : > { %v511_v5 = vadd.f32 %v506_v0, %v486_v3 }
 0x272   : > { %v533_v2 = vpop.permute.xlu0 %532 }
 0x273   : > { %v531_v9 = vpop.permute.xlu1 %530  ;;  %v537_v21 = vadd.f32 %v533_v2, %v512_v6 }
 0x274   : > { %v536_v11 = vadd.f32 %v531_v9, %v511_v5 }
 0x275   : > { %v557_v24 = vadd.f32 %v553_v36, %v537_v21 }
 0x276   : > { %v556_v16 = vadd.f32 %v551_v46, %v536_v11  ;;  %v573_v63 = vpop.permute.xlu0 %572 }
 0x277   : > { %v651_v19 = vpop.permute.xlu1 %650  ;;  %v577_v25 = vadd.f32 %v573_v63, %v557_v24 }
 0x278   : > { %v576_v18 = vadd.f32 %v571_v32, %v556_v16 }
 0x27a   : > { %v596_v45 = vadd.f32 %v591_v33, %v576_v18  ;;  %v593_v20 = vpop.permute.xlu0 %592 }
 0x27b   : > { %v671_v22 = vpop.permute.xlu1 %670  ;;  %v597_v23 = vadd.f32 %v593_v20, %v577_v25 }
 0x27c   : > { %v616_v13 = vadd.f32 %v611_v10, %v596_v45 }
 0x27e   : > { %v613_v12 = vpop.permute.xlu0 %612  ;;  %v636_v55 = vadd.f32 %v631_v35, %v616_v13 }
 0x27f   : > { %v691_v57 = vpop.permute.xlu1 %690  ;;  %v617_v27 = vadd.f32 %v613_v12, %v597_v23 }
 0x280   : > { %v656_v49 = vadd.f32 %v651_v19, %v636_v55 }
 0x282   : > { %v633_v14 = vpop.permute.xlu0 %632  ;;  %v676_v28 = vadd.f32 %v671_v22, %v656_v49 }
 0x283   : > { %v637_v29 = vadd.f32 %v633_v14, %v617_v27  ;;  %v704_v61 = vpop.permute.xlu1 %703 }
 0x284   : > { %v696_v46 = vadd.f32 %v691_v57, %v676_v28  ;;  %v706_v32 = vmul.f32 %v704_v61, %v1025_v50  ;;  %v707_v34 = vmul.f32 %v704_v61, %v1031_v53  ;;  %v726_v50 = vrot.slane %v967_v8, %v1132_v42 }
 0x286   : > { %v653_v59 = vpop.permute.xlu0 %652  ;;  %v708_v37 = vadd.f32 %v706_v32, %v696_v46 }
 0x287   : > { %v657_v31 = vadd.f32 %v653_v59, %v637_v29  ;;  %v713_v38 = vpop.permute.xlu1 %712 }
 0x28a   : > { %v673_v30 = vpop.permute.xlu0 %672 }
 0x28b   : > { %v677_v33 = vadd.f32 %v673_v30, %v657_v31 }
 0x28e   : > { %v693_v10 = vpop.permute.xlu0 %692 }
 0x28f   : > { %v697_v35 = vadd.f32 %v693_v10, %v677_v33 }
 0x291   : > { %v709_v36 = vadd.f32 %v707_v34, %v697_v35 }
 0x292   : > { %v711_v26 = vpop.permute.xlu0 %710 }
 0x293   : > { %v717_v39 = vmul.f32 %v713_v38, %v709_v36  ;;  %v716_v40 = vmul.f32 %v711_v26, %v708_v37 }
 0x295   : > { %v718_v41 = vpack.c.bf16 %v717_v39, %v716_v40 }
 0x297   : > { %728 = vrot.lane.b32.xlu0 %v718_v41, %s906_s7 }
 0x309   : > { %v729_v1 = vpop.permute.xlu0 %728 }
 0x30a   : > { %877 = vmatmul.mubr.msk.bf16.vlgmr.msra.gmra.mrb[0].mxu1 %vm742_vm8, %v729_v1 }
 0x3dd   : > { %v780_v53 = vpop.f32.mrb[0].mxu1 }
 0x3de   : > { %v781_v43 = vadd.f32 %v780_v53, %v726_v50  ;;  %v878_v47 = vpop.f32.mrb[1].mxu1 }
 0x3df   : > { %v783_v48 = vpop.f32.mrb[2].mxu1 }
 0x3e0   : > { %787 = vst.msk [vmem:[%s226_s16] sm:$0xff] %vm245_vm1, %v781_v43  ;;  %v784_v51 = vadd.f32 %v783_v48, %v726_v50  ;;  %v879_v44 = vpop.f32.mrb[3].mxu1 }
 0x3e2   : > { %788 = vst.msk [vmem:[%s226_s16 + $0x8] sm:$0xff] %vm245_vm1, %v784_v51 }
 0x3e3 PF: > { %s15_s18 = sadd.s32 1, %s901_s18  }
 0x3e4   : > { %p12_p4 = scmp.ge.s32.totalorder %s15_s18, 4  }
 0x3e6   :  { %14 = sbr.rel (!%p12_p4) target bundleno = 1 (0x1), region = 70 }

</bundles_post_ra>
